<compile_context>
chip_gen: v7x
topology: tpu7x:2x2x1
jax: 0.10.0
libtpu: 0.0.40
codegen_flags: <defaults>
</compile_context>

<pallas_src>
import jax
import jax.numpy as jnp
from jax.experimental import pallas as pl
from jax.experimental.pallas import tpu as pltpu

# "config" (no learnable parameters in this module)
G = 4            # num_code_vector_groups
V = 16           # num_code_vectors_per_group
ALPHA = 0.1      # loss_alpha

_LANE = 128
_SUBLANE = 8


def _round_up(x, m):
    return ((x + m - 1) // m) * m


def _vmem_capacity_bytes():
    try:
        cap = getattr(pltpu.get_tpu_info(), "vmem_capacity_bytes", None)
        if cap:
            return int(cap)
    except Exception:
        pass
    return 64 * 1024 * 1024     # conservative fallback (v7x physical VMEM)


def _pick_row_tile(num_rows, num_classes, itemsize, vmem_cap):
    """Row tile sized so double-buffered x+labels streams use ~40% of physical
    VMEM (~25 MiB on v7x's 64 MiB, ~51 MiB on v5e/v6e's 128 MiB)."""
    budget = min((vmem_cap * 2) // 5, 56 * 1024 * 1024)
    c_pad = _round_up(max(num_classes, _LANE), _LANE)
    per_row_bytes = 2 * c_pad * itemsize              # x block + labels block
    tile = budget // (2 * per_row_bytes)              # "2" == double buffering
    tile = max(_LANE, min(16384, (tile // _LANE) * _LANE))
    tile = min(tile, _round_up(num_rows, _LANE))      # don't over-pad tiny inputs
    return int(tile)


def _vmem_limit_bytes(tile, num_classes, itemsize, vmem_cap):
    c_pad = _round_up(max(num_classes, _LANE), _LANE)
    resident = 2 * 2 * tile * c_pad * itemsize                 # x + labels, dbl-buffered
    resident += 2 * _SUBLANE * _round_up(tile, _LANE) * 4      # w blocks (sublane-padded)
    resident += 2 * _SUBLANE * c_pad * 4                       # output block
    return int(min(vmem_cap - (4 << 20), max(32 << 20, resident + (16 << 20))))


def ce_pretrain_with_diversity_loss(target_encoder_out, labels, perplexity,
                                    time_mask_indices, *, alpha=ALPHA,
                                    row_tile=None, num_core_partials=1):
    B, T, C = target_encoder_out.shape
    g, v = perplexity.shape
    rows = B * T

    x2 = target_encoder_out.reshape(rows, C)
    lab2 = labels.reshape(rows, C)

    vmem_cap = _vmem_capacity_bytes()
    itemsize = target_encoder_out.dtype.itemsize
    if row_tile is None:
        tile = _pick_row_tile(rows, C, itemsize, vmem_cap)
    else:
        tile = max(_LANE, _round_up(int(row_tile), _LANE))

    parts = max(1, int(num_core_partials))
    nblocks = -(-rows // tile)
    tiles_per_part = -(-nblocks // parts)
    rows_span = parts * tiles_per_part * tile
    needs_mask = rows_span != rows            # ragged tail and/or overshoot blocks

    # Per-row weights, lane-major (tiny: rows_span * 4 bytes). 1.0 for rows whose
    # batch element is masked-in, 0.0 otherwise / for padding.
    mask_f = time_mask_indices.astype(jnp.float32)                       # (B,)
    w = jnp.broadcast_to(mask_f[:, None], (B, T)).reshape(1, rows)
    if rows_span > rows:
        w = jnp.pad(w, ((0, 0), (0, rows_span - rows)))

    def row_block(c, i):
        # Clamp so overshoot blocks (parts not dividing nblocks) re-read the last
        # valid block instead of DMA'ing out of bounds; their contribution is
        # zeroed by the in-kernel row mask.
        return (jnp.minimum(c * tiles_per_part + i, nblocks - 1), 0)

    def kernel(x_ref, lab_ref, w_ref, out_ref):
        i = pl.program_id(1)

        @pl.when(i == 0)
        def _():
            out_ref[...] = jnp.zeros_like(out_ref)

        x = x_ref[...].astype(jnp.float32)       # (tile, C) logits
        lab = lab_ref[...].astype(jnp.float32)   # (tile, C) raw labels
        w_blk = w_ref[...]                       # (1, tile) f32 row weights

        # sigmoid via a single transcendental (no divide): sigma(z) = 0.5*tanh(z/2)+0.5
        p = 0.5 * jnp.tanh(0.5 * lab) + 0.5

        # numerically-stable log-sum-exp over the class (lane) axis
        m = jnp.max(x, axis=-1, keepdims=True)
        lse = jnp.log(jnp.sum(jnp.exp(x - m), axis=-1, keepdims=True)) + m

        # fused soft-CE:  row_ce = sum_c p*(lse - x)   (reduction deferred to MXU)
        q = p * (lse - x)                        # (tile, C)

        if needs_mask:
            # zero contributions of rows beyond the real row count (garbage tail /
            # re-read overshoot blocks); jnp.where avoids 0*NaN hazards.
            row0 = (pl.program_id(0) * tiles_per_part + i) * tile
            rid = jax.lax.broadcasted_iota(jnp.int32, (tile, 1), 0) + row0
            q = jnp.where(rid < rows, q, 0.0)

        # Weighted row reduction on the (otherwise idle) MXU: (1,tile)@(tile,C).
        # The class axis is reduced to a scalar once, in the wrapper.
        out_ref[...] += jnp.dot(w_blk, q, preferred_element_type=jnp.float32)[None]

    if parts > 1:
        dims = (pltpu.CORE_PARALLEL, pltpu.ARBITRARY)   # per-core partials (v7x)
    else:
        dims = (pltpu.ARBITRARY, pltpu.ARBITRARY)

    partials = pl.pallas_call(
        kernel,
        out_shape=jax.ShapeDtypeStruct((parts, 1, C), jnp.float32),
        grid=(parts, tiles_per_part),
        in_specs=[
            pl.BlockSpec((tile, C), row_block),
            pl.BlockSpec((tile, C), row_block),
            pl.BlockSpec((1, tile), lambda c, i: (0, c * tiles_per_part + i)),
        ],
        out_specs=pl.BlockSpec((1, 1, C), lambda c, i: (c, 0, 0)),
        compiler_params=pltpu.CompilerParams(
            dimension_semantics=dims,
            vmem_limit_bytes=_vmem_limit_bytes(tile, C, itemsize, vmem_cap)),
    )(x2, lab2, w)

    # finalize (tiny scalar math; done outside the kernel on purpose)
    ce_sum = jnp.sum(partials)
    n_masked = jnp.sum(mask_f)
    ce = ce_sum / n_masked          # NaN if mask is all-false, matching PyTorch
    perp = perplexity.astype(jnp.float32)
    div = jnp.sum(perp * jnp.log(perp)) / (g * v)   # NaN hazard if perp has zeros (same as torch)
    loss = ce + alpha * div
    return loss, ce, div


def _reference(x, lab, perp, mask, alpha=ALPHA):
    """Plain-JAX reference mirroring the PyTorch forward (concrete mask)."""
    xm = x[mask]                                  # (N, T, C)
    lm = jax.nn.sigmoid(lab[mask])                # (N, T, C)
    log_sm = jax.nn.log_softmax(xm, axis=-1)
    frame_losses = jnp.mean(-jnp.sum(lm * log_sm, axis=-1), axis=0)   # (T,)
    ce = jnp.sum(frame_losses)
    div = jnp.sum(perp * jnp.log(perp)) / (perp.shape[0] * perp.shape[1])
    return ce + alpha * div, ce, div


if __name__ == "__main__":
    key = jax.random.PRNGKey(0)
    k1, k2, k3, k4 = jax.random.split(key, 4)

    # B*T = 240 rows: not a multiple of a 128-row tile -> exercises the in-kernel
    # ragged-tail masking path (no wrapper pad of the big tensors).
    B, T, C = 6, 40, 128
    target_encoder_out = jax.random.normal(k1, (B, T, C), dtype=jnp.float32)
    labels = jax.random.normal(k2, (B, T, C), dtype=jnp.float32)
    # perplexity must be positive: per-group softmax of random scores
    perplexity = jax.nn.softmax(jax.random.normal(k3, (G, V), dtype=jnp.float32), axis=-1)
    # boolean mask over the batch dim; guarantee at least one selected row
    time_mask_indices = jax.random.bernoulli(k4, 0.5, (B,)).at[0].set(True)

    # explicit 128-row tile -> grid (1, 2): multi-step accumulation + ragged mask
    loss, ce, div = ce_pretrain_with_diversity_loss(
        target_encoder_out, labels, perplexity, time_mask_indices, row_tile=128)
    jax.block_until_ready((loss, ce, div))

    # default (auto-sized) tile path: single ragged block
    loss2, ce2, div2 = ce_pretrain_with_diversity_loss(
        target_encoder_out, labels, perplexity, time_mask_indices)
    jax.block_until_ready((loss2, ce2, div2))

    ref_loss, ref_ce, ref_div = _reference(
        target_encoder_out, labels, perplexity, time_mask_indices)

    for got, want in ((loss, ref_loss), (ce, ref_ce), (div, ref_div),
                      (loss2, ref_loss), (ce2, ref_ce), (div2, ref_div)):
        assert jnp.allclose(got, want, rtol=1e-3, atol=1e-3), (got, want)

    print("KERNEL_OK")
</pallas_src>

<mosaic_0001>
module attributes {stable_mosaic.version = 11 : i64} {
  func.func @kernel(%arg0: i32, %arg1: i32, %arg2: memref<128x128xf32, #tpu.memory_space<vmem>>, %arg3: memref<128x128xf32, #tpu.memory_space<vmem>>, %arg4: memref<1x128xf32, #tpu.memory_space<vmem>>, %arg5: memref<1x1x128xf32, #tpu.memory_space<vmem>>) attributes {dimension_semantics = [#tpu.dimension_semantics<arbitrary>, #tpu.dimension_semantics<arbitrary>], iteration_bounds = array<i64: 1, 2>, scalar_prefetch = 0 : i64, scratch_operands = 0 : i64, tpu.core_type = #tpu.core_type<tc>, window_params = [{transform_indices = @transform_0, window_bounds = array<i64: 128, 128>}, {transform_indices = @transform_1, window_bounds = array<i64: 128, 128>}, {transform_indices = @transform_2, window_bounds = array<i64: 1, 128>}, {transform_indices = @transform_3, window_bounds = array<i64: 1, 1, 128>}]} {
    %c0_i32 = arith.constant 0 : i32
    %0 = arith.cmpi eq, %arg1, %c0_i32 : i32
    %1 = arith.extui %0 : i1 to i32
    %c0_i32_0 = arith.constant 0 : i32
    %2 = arith.cmpi ne, %1, %c0_i32_0 : i32
    scf.if %2 {
      %cst_18 = arith.constant 0.000000e+00 : f32
      %42 = vector.broadcast %cst_18 : f32 to vector<1x1x128xf32>
      %c0_19 = arith.constant 0 : index
      %c0_20 = arith.constant 0 : index
      %c0_21 = arith.constant 0 : index
      %43 = vector.load %arg5[%c0_19, %c0_20, %c0_21] : memref<1x1x128xf32, #tpu.memory_space<vmem>>, vector<1x1x128xf32>
      tpu.vector_store %arg5[%c0_19, %c0_20, %c0_21], %42 {strides = array<i32>} : memref<1x1x128xf32, #tpu.memory_space<vmem>>, vector<1x1x128xf32>,
    } else {
    }
    %c0 = arith.constant 0 : index
    %c0_1 = arith.constant 0 : index
    %3 = vector.load %arg2[%c0, %c0_1] : memref<128x128xf32, #tpu.memory_space<vmem>>, vector<128x128xf32>
    %c0_2 = arith.constant 0 : index
    %c0_3 = arith.constant 0 : index
    %4 = vector.load %arg3[%c0_2, %c0_3] : memref<128x128xf32, #tpu.memory_space<vmem>>, vector<128x128xf32>
    %c0_4 = arith.constant 0 : index
    %c0_5 = arith.constant 0 : index
    %5 = vector.load %arg4[%c0_4, %c0_5] : memref<1x128xf32, #tpu.memory_space<vmem>>, vector<1x128xf32>
    %cst = arith.constant 5.000000e-01 : f32
    %6 = vector.broadcast %cst : f32 to vector<128x128xf32>
    %7 = arith.mulf %6, %4 : vector<128x128xf32>
    %8 = math.tanh %7 : vector<128x128xf32>
    %cst_6 = arith.constant 5.000000e-01 : f32
    %9 = vector.broadcast %cst_6 : f32 to vector<128x128xf32>
    %10 = arith.mulf %9, %8 : vector<128x128xf32>
    %cst_7 = arith.constant 5.000000e-01 : f32
    %11 = vector.broadcast %cst_7 : f32 to vector<128x128xf32>
    %12 = arith.addf %10, %11 : vector<128x128xf32>
    %cst_8 = arith.constant dense<0xFF800000> : vector<128xf32>
    %13 = vector.multi_reduction <maximumf>, %3, %cst_8 [1] : vector<128x128xf32> to vector<128xf32>
    %14 = vector.shape_cast %13 : vector<128xf32> to vector<128x1xf32>
    %15 = vector.broadcast %14 : vector<128x1xf32> to vector<128x128xf32>
    %16 = arith.subf %3, %15 : vector<128x128xf32>
    %17 = math.exp %16 : vector<128x128xf32>
    %cst_9 = arith.constant dense<0.000000e+00> : vector<128xf32>
    %18 = vector.multi_reduction <add>, %17, %cst_9 [1] : vector<128x128xf32> to vector<128xf32>
    %19 = vector.shape_cast %18 : vector<128xf32> to vector<128x1xf32>
    %20 = math.log %19 : vector<128x1xf32>
    %21 = arith.addf %20, %14 : vector<128x1xf32>
    %22 = vector.broadcast %21 : vector<128x1xf32> to vector<128x128xf32>
    %23 = arith.subf %22, %3 : vector<128x128xf32>
    %24 = arith.mulf %12, %23 : vector<128x128xf32>
    %c2_i32 = arith.constant 2 : i32
    %25 = arith.muli %arg0, %c2_i32 : i32
    %26 = arith.addi %25, %arg1 : i32
    %c128_i32 = arith.constant 128 : i32
    %27 = arith.muli %26, %c128_i32 : i32
    %28 = tpu.iota {dimensions = array<i32: 0>} : vector<128x1xi32>
    %29 = vector.broadcast %27 : i32 to vector<128x1xi32>
    %30 = arith.addi %28, %29 : vector<128x1xi32>
    %c240_i32 = arith.constant 240 : i32
    %31 = vector.broadcast %c240_i32 : i32 to vector<128x1xi32>
    %32 = arith.cmpi slt, %30, %31 : vector<128x1xi32>
    %cst_10 = arith.constant 0.000000e+00 : f32
    %33 = vector.shape_cast %32 : vector<128x1xi1> to vector<128x1xi1>
    %34 = vector.broadcast %33 : vector<128x1xi1> to vector<128x128xi1>
    %35 = vector.broadcast %cst_10 : f32 to vector<128x128xf32>
    %36 = arith.select %34, %24, %35 : vector<128x128xi1>, vector<128x128xf32>
    %c0_11 = arith.constant 0 : index
    %c0_12 = arith.constant 0 : index
    %c0_13 = arith.constant 0 : index
    %37 = vector.load %arg5[%c0_11, %c0_12, %c0_13] : memref<1x1x128xf32, #tpu.memory_space<vmem>>, vector<1x1x128xf32>
    %cst_14 = arith.constant dense<0.000000e+00> : vector<1x128xf32>
    %38 = tpu.matmul %5, %36, %cst_14 {dimension_numbers = #tpu.dot_dimension_numbers<[1], [0], [0], [1], [0, 0, 1, 1], [], []>} : vector<1x128xf32>, vector<128x128xf32>, vector<1x128xf32> -> vector<1x128xf32>
    %39 = vector.shape_cast %38 : vector<1x128xf32> to vector<1x1x128xf32>
    %40 = arith.addf %37, %39 : vector<1x1x128xf32>
    %c0_15 = arith.constant 0 : index
    %c0_16 = arith.constant 0 : index
    %c0_17 = arith.constant 0 : index
    %41 = vector.load %arg5[%c0_15, %c0_16, %c0_17] : memref<1x1x128xf32, #tpu.memory_space<vmem>>, vector<1x1x128xf32>
    tpu.vector_store %arg5[%c0_15, %c0_16, %c0_17], %40 {strides = array<i32>} : memref<1x1x128xf32, #tpu.memory_space<vmem>>, vector<1x1x128xf32>,
    return
  }
  func.func @transform_0(%arg0: i32, %arg1: i32) -> (i32, i32) {
    %c2_i32 = arith.constant 2 : i32
    %0 = arith.muli %arg0, %c2_i32 : i32
    %1 = arith.addi %0, %arg1 : i32
    %c1_i32 = arith.constant 1 : i32
    %2 = arith.minsi %1, %c1_i32 : i32
    %c0_i32 = arith.constant 0 : i32
    %c0_i32_0 = arith.constant 0 : i32
    return %2, %c0_i32 : i32, i32
  }
  func.func @transform_1(%arg0: i32, %arg1: i32) -> (i32, i32) {
    %c2_i32 = arith.constant 2 : i32
    %0 = arith.muli %arg0, %c2_i32 : i32
    %1 = arith.addi %0, %arg1 : i32
    %c1_i32 = arith.constant 1 : i32
    %2 = arith.minsi %1, %c1_i32 : i32
    %c0_i32 = arith.constant 0 : i32
    %c0_i32_0 = arith.constant 0 : i32
    return %2, %c0_i32 : i32, i32
  }
  func.func @transform_2(%arg0: i32, %arg1: i32) -> (i32, i32) {
    %c2_i32 = arith.constant 2 : i32
    %0 = arith.muli %arg0, %c2_i32 : i32
    %1 = arith.addi %0, %arg1 : i32
    %c0_i32 = arith.constant 0 : i32
    %c0_i32_0 = arith.constant 0 : i32
    return %c0_i32, %1 : i32, i32
  }
  func.func @transform_3(%arg0: i32, %arg1: i32) -> (i32, i32, i32) {
    %c0_i32 = arith.constant 0 : i32
    %c0_i32_0 = arith.constant 0 : i32
    %c0_i32_1 = arith.constant 0 : i32
    return %arg0, %c0_i32, %c0_i32_0 : i32, i32, i32
  }
}

</mosaic_0001>

<bundles_post_ra>
// kernel: tpu_custom_call.1
= control target key start
LH: loop header
LB: loop body
LE: loop exit
PB: predicated region body
PF: predicated region fallthrough
CT: control target
= control target key end

     0   :  { %8 = vsyncpa [#allocation3], 0  ;;  %s1911_s0 = inlined_call_operand.hbm [shape: f32[240,128], index: 0, kind: input, shape index: {}]   ;;  %s1912_s1 = inlined_call_operand.hbm [shape: f32[240,128], index: 1, kind: input, shape index: {}]   ;;  %s1913_s2 = inlined_call_operand.vmem [shape: f32[1,256], index: 2, kind: input, shape index: {}]   ;;  %s1914_s3 = inlined_call_operand.hbm [shape: f32[1,1,128], index: 3, kind: output, shape index: {}]  }
   0x1   :  { %10 = vsyncpa [#allocation3 + $0x1], 0 }
   0x2   :  { %11 = vsyncpa [#allocation6], 0 }
   0x3   :  { %13 = vsyncpa [#allocation6 + $0x1], 0 }
   0x4   :  { %14 = vsyncpa [#allocation4], 0  ;;  %s1348_s12 = smov 0   ;;  %s1350_s13 = smov 0  }
   0x5   :  { %s1352_s14 = smov 0   ;;  %s1354_s15 = smov 0  }
   0x6   :  { %s1356_s16 = smov 0   ;;  %s1358_s17 = smov 0  }
   0x7 LB: > { %s29_s18 = sadd.s32 1, %s1311_s16  ;;  %p38_p1 = scmp.lt.s32.totalorder %s1311_s16, 1  ;;  %s1315_s17 = sphi %s1358_s17, %s20_s17   ;;  %s1311_s16 = sphi %s1356_s16, %s1947_s16   ;;  %s1307_s15 = sphi %s1354_s15, %s1946_s15   ;;  %s1303_s14 = sphi %s1352_s14, %s1945_s14   ;;  %s1299_s13 = sphi %s1350_s13, %s1944_s13   ;;  %s1295_s12 = sphi %s1348_s12, %s1943_s12  }
   0x8   : > { %p30_p0 = scmp.ge.s32.totalorder %s29_s18, 2  ;;  %s886_s19 = sadd.s32 4294967295, %s1315_s17  }
   0x9   : > { %p54_p2 = scmp.ne.s32.totalorder %s1303_s14, %s1299_s13  ;;  %p55_p4 = scmp.eq.s32.totalorder %s1315_s17, 0 }
   0xa   : > { %s1949_s18 = smov (%p30_p0, %s29_s18), 0  ;;  %p60_p5 = scmp.ne.s32.totalorder %s1299_s13, %s1295_s12 }
   0xb   : > { %s1384_s20 = scalar_select %p38_p1, %s1311_s16, 1 }
   0xc   : > { %p42_p3 = scmp.lt.s32.totalorder %s1949_s18, 1  ;;  %p61_p6 = scmp.eq.s32.totalorder %s886_s19, 0 }
   0xd   : > { %p1392_p7 = por %p55_p4, %p54_p2  ;;  %s47_s25 = sadd.s32 1, %s1303_s14 }
   0xe   : > { %s43_s21 = scalar_select %p42_p3, %s1949_s18, 1 }
   0xf   : > { %p1396_p8 = por %p61_p6, %p60_p5  ;;  %p888_p10 = scmp.ge.s32.totalorder %s1315_s17, 2 }
  0x10   : > { %s44_s24 = ssub.s32 %s1384_s20, %s43_s21 }
  0x11   : > { %p45_p9 = scmp.eq.s32.totalorder %s44_s24, 0  ;;  %170 = sbr.rel (%p888_p10) target bundleno = 94 (0x5e), region = 16 }
  0x13   : > { %s1403_s26 = scalar_select %p45_p9, %s1303_s14, %s47_s25  }
  0x18   : > { %173 = sbr.rel (!%p1392_p7) target bundleno = 59 (0x3b), region = 20  ;;  %s174_s27 = sand.u32 (%p1392_p7), 1, %s1303_s14  }
  0x19   : > { %s890_s28 = sshll.u32 (%p1392_p7), %s1384_s20, 4  ;;  %s889_s29 = sshll.u32 (%p1392_p7), %s174_s27, 7 }
  0x1a   : > { %s184_s30 = ssub.s32 (%p1392_p7), 30, %s890_s28  ;;  %s1413_s6 = scalar_lea.sflag (%p1392_p7), [#allocation3], %s174_s27 }
  0x1b   : > { %p185_p11 = scmp.lt.s32.totalorder (%p1392_p7), %s184_s30, 16  ;;  %s178_s7 = scalar_lea.vmem (%p1392_p7), [#allocation2], %s889_s29 }
  0x1f   : > { %s1951_s30 = smov (!%p185_p11, %s184_s30), 16 }
  0x20   : > { %s1410_s4 = sshll.u32 %s1951_s30, 7 }
  0x21   : > { %s189_s5 = ssub.s32 2048, %s1410_s4 }
  0x22   : > { %190 = vsyncadd %s1413_s6, %s189_s5  ;;  %p892_p12 = scmp.ne.s32.totalorder %s1410_s4, 0  ;;  %s928_s8 = sshll.u32 %s1384_s20, 11 }
  0x23   : > { %s1421_s11 = scalar_lea.hbm %s1911_s0, %s928_s8  ;;  %s195_s12 = sshll.u32 %s178_s7, 4  ;;  %s1423_s12 = int_to_ptr.vmem [resolvable:$true] %s195_s12 }
  0x24   : > { %s1175_s21 = scalar_lea.hbm %s1421_s11, %s1410_s4  ;;  %s1179_s27 = scalar_lea.hbm %s1911_s0, 3840 }
  0x25   : > { %p1176_p13 = scmp.ne.s32.totalorder %s1421_s11, %s1175_s21  ;;  %p1180_p2 = scmp.lt.u32.totalorder %s1421_s11, %s1911_s0 }
  0x26   : > { %p1181_p3 = scmp.lt.u32.totalorder %s1179_s27, %s1175_s21  ;;  %p1183_p5 = scmp.lt.u32.totalorder %s1175_s21, %s1421_s11 }
  0x27   : > { %p1177_p0 = pnand %p1176_p13, %p892_p12 }
  0x28   : > { %p1182_p4 = por %p1181_p3, %p1180_p2 }
  0x29   : > { %p1178_p1 = pneg %p1177_p0 }
  0x2a   : > { %p1184_p6 = por %p1183_p5, %p1182_p4 }
  0x2c   : > { %p1185_p9 = pnand %p1184_p6, %p1178_p1 }
  0x2e   : > { %1188 = shalt.err (!%p1185_p9)
}
  0x2f   : > { %s1189_s30 = scalar_lea.vmem %s1423_s12, %s1410_s4  ;;  %s1317_s5 = smov [#allocation2]  }
  0x30   : > { %p1190_p10 = scmp.ne.s32.totalorder %s1423_s12, %s1189_s30  ;;  %s1193_s7 = sshll.u32 %s1317_s5, 4  ;;  %s1194_s7 = int_to_ptr.vmem [resolvable:$false] %s1193_s7 }
  0x31   : > { %s1195_s8 = scalar_lea.vmem %s1194_s7, 4096  ;;  %p1196_p0 = scmp.lt.s32.totalorder %s1423_s12, %s1194_s7 }
  0x32   : > { %p1191_p11 = pnand %p1190_p10, %p892_p12  ;;  %p1197_p2 = scmp.lt.s32.totalorder %s1195_s8, %s1189_s30 }
  0x34   : > { %p1192_p13 = pneg %p1191_p11  ;;  %p1198_p3 = por %p1197_p2, %p1196_p0 }
  0x36   : > { %p1199_p4 = pnand %p1198_p3, %p1192_p13 }
  0x38   : > { %1202 = shalt.err (!%p1199_p4)
}
  0x39   : > { %s1318_s9 = smov 128   ;;  %s1319_s10 = smov 8  }
  0x3a   : > { %201 = dma.hbm_to_vmem [thread:$0]  (%p892_p12), %s1421_s11, %s1410_s4, %s1423_s12, %s1413_s6, %s1318_s9, %s1318_s9, %s1319_s10  }
  0x3b PF: > { %204 = sbr.rel (!%p1392_p7) target bundleno = 94 (0x5e), region = 24  ;;  %s205_s21 = sand.u32 (%p1392_p7), 1, %s1303_s14  }
  0x3c   : > { %s897_s24 = sshll.u32 (%p1392_p7), %s1384_s20, 4  ;;  %s896_s25 = sshll.u32 (%p1392_p7), %s205_s21, 7 }
  0x3d   : > { %s215_s27 = ssub.s32 (%p1392_p7), 30, %s897_s24  ;;  %s1457_s30 = scalar_lea.sflag (%p1392_p7), [#allocation6], %s205_s21 }
  0x3e   : > { %p216_p1 = scmp.lt.s32.totalorder (%p1392_p7), %s215_s27, 16  ;;  %s209_s4 = scalar_lea.vmem (%p1392_p7), [#allocation5], %s896_s25 }
  0x42   : > { %s1953_s27 = smov (!%p216_p1, %s215_s27), 16 }
  0x43   : > { %s1454_s28 = sshll.u32 %s1953_s27, 7 }
  0x44   : > { %s220_s29 = ssub.s32 2048, %s1454_s28 }
  0x45   : > { %221 = vsyncadd %s1457_s30, %s220_s29  ;;  %p899_p7 = scmp.ne.s32.totalorder %s1454_s28, 0  ;;  %s929_s22 = sshll.u32 %s1384_s20, 11 }
  0x46   : > { %s1465_s12 = scalar_lea.hbm %s1912_s1, %s929_s22  ;;  %s226_s5 = sshll.u32 %s209_s4, 4  ;;  %s1467_s5 = int_to_ptr.vmem [resolvable:$true] %s226_s5 }
  0x47   : > { %s1203_s7 = scalar_lea.hbm %s1465_s12, %s1454_s28  ;;  %s1207_s20 = scalar_lea.hbm %s1912_s1, 3840 }
  0x48   : > { %p1204_p12 = scmp.ne.s32.totalorder %s1465_s12, %s1203_s7  ;;  %p1208_p9 = scmp.lt.u32.totalorder %s1465_s12, %s1912_s1 }
  0x49   : > { %p1209_p10 = scmp.lt.u32.totalorder %s1207_s20, %s1203_s7  ;;  %p1211_p13 = scmp.lt.u32.totalorder %s1203_s7, %s1465_s12 }
  0x4a   : > { %p1205_p5 = pnand %p1204_p12, %p899_p7 }
  0x4b   : > { %p1210_p11 = por %p1209_p10, %p1208_p9 }
  0x4c   : > { %p1206_p6 = pneg %p1205_p5 }
  0x4d   : > { %p1212_p0 = por %p1211_p13, %p1210_p11 }
  0x4f   : > { %p1213_p2 = pnand %p1212_p0, %p1206_p6 }
  0x51   : > { %1216 = shalt.err (!%p1213_p2)
}
  0x52   : > { %s1217_s24 = scalar_lea.vmem %s1467_s5, %s1454_s28  ;;  %s1320_s25 = smov [#allocation5]  }
  0x53   : > { %p1218_p3 = scmp.ne.s32.totalorder %s1467_s5, %s1217_s24  ;;  %s1221_s27 = sshll.u32 %s1320_s25, 4  ;;  %s1222_s27 = int_to_ptr.vmem [resolvable:$false] %s1221_s27 }
  0x54   : > { %s1223_s29 = scalar_lea.vmem %s1222_s27, 4096  ;;  %p1224_p12 = scmp.lt.s32.totalorder %s1467_s5, %s1222_s27 }
  0x55   : > { %p1219_p4 = pnand %p1218_p3, %p899_p7  ;;  %p1225_p5 = scmp.lt.s32.totalorder %s1223_s29, %s1217_s24 }
  0x57   : > { %p1220_p1 = pneg %p1219_p4  ;;  %p1226_p9 = por %p1225_p5, %p1224_p12 }
  0x59   : > { %p1227_p10 = pnand %p1226_p9, %p1220_p1 }
  0x5b   : > { %1230 = shalt.err (!%p1227_p10)
}
  0x5c   : > { %s1321_s4 = smov 128   ;;  %s1322_s22 = smov 8  }
  0x5d   : > { %232 = dma.hbm_to_vmem [thread:$0]  (%p899_p7), %s1465_s12, %s1454_s28, %s1467_s5, %s1457_s30, %s1321_s4, %s1321_s4, %s1322_s22  }
  0x5e PF: > { %p903_p6 = scmp.ge.s32.totalorder %s1315_s17, 1  ;;  %p244_p11 = scmp.lt.s32.totalorder %s1315_s17, 3 }
  0x60   : > { %p245_p13 = pnand %p903_p6, %p244_p11 }
  0x62   : > { %248 = sbr.rel (%p245_p13) target bundleno = 706 (0x2c2), region = 32 }
  0x69   : > { %s250_s6 = sand.u32 1, %s1299_s13  }
  0x6a   : > { %s904_s11 = sshll.u32 %s250_s6, 7  ;;  %s251_s7 = scalar_lea.sflag [#allocation3], %s250_s6 }
  0x6b   : > { %s1497_s8 = scalar_lea.vmem [#allocation2], %s904_s11 }
  0x6c   : > { %1282 = dma.done.wait (%p1396_p8), %s251_s7, 2048  }
  0x6d   : > { %1284 = vsyncadd (%p1396_p8), %s251_s7, 4294965248  ;;  %s260_s28 = scalar_lea.sflag [#allocation6], %s250_s6  ;;  %s1503_s30 = scalar_lea.vmem [#allocation5], %s904_s11 }
  0x6e   : > { %1286 = dma.done.wait (%p1396_p8), %s260_s28, 2048  }
  0x6f   : > { %1288 = vsyncadd (%p1396_p8), %s260_s28, 4294965248  ;;  %p311_p7 = scmp.lt.s32.totalorder %s1307_s15, 1  ;;  %p906_p0 = scmp.ne.s32.totalorder %s1307_s15, 0 }
  0x70   : > { %v1323_v0 = vmov (!%p906_p0), 0.0  }
  0x71   : > { %s1511_s12 = scalar_select %p311_p7, %s1307_s15, 1 }
  0x72   : > { %319 = sbr.rel (%p906_p0) target bundleno = 121 (0x79), region = 44  ;;  %320 = vst [vmem:[#allocation7] sm:$0x1] (!%p906_p0), %v1323_v0 }
  0x73   : > { %s313_s20 = scalar_lea.vmem %s1913_s2, %s1511_s12 }
  0x79 PF: > { %v1519_v1 = vld [vmem:[%s1497_s8] sm:$0xff]  ;;  %v1522_v2 = vld [vmem:[%s1497_s8 + $0x10] sm:$0xff]  ;;  %v1527_v3 = vld [vmem:[%s1497_s8 + $0x8] sm:$0xff]  ;;  %vm1325_vm0 = vmmov 0   ;;  %s907_s23 = sshll.u32 %s1307_s15, 7  ;;  %s1327_s21 = smov [#allocation7]  }
  0x7a   : > { %418 = vmax.xlane.f32.xlu0 %v1519_v1  ;;  %422 = vmax.xlane.f32.xlu1 %v1522_v2  ;;  %v1530_v4 = vld [vmem:[%s1497_s8 + $0x18] sm:$0xff]  ;;  %v1535_v5 = vld [vmem:[%s1497_s8 + $0x20] sm:$0xff]  ;;  %v1538_v6 = vld [vmem:[%s1497_s8 + $0x28] sm:$0xff]  ;;  %s793_s24 = sshll.u32 %s1327_s21, 4  ;;  %p1867_p8 = scmp.eq.s32.totalorder %s886_s19, 1  ;;  %s794_s24 = int_to_ptr.vmem [resolvable:$true] %s793_s24 }
  0x7b   : > { %v1543_v7 = vld [vmem:[%s1497_s8 + $0x30] sm:$0xff]  ;;  %v1546_v8 = vld [vmem:[%s1497_s8 + $0x38] sm:$0xff]  ;;  %v1551_v9 = vld [vmem:[%s1497_s8 + $0x40] sm:$0xff]  ;;  %s1231_s27 = scalar_lea.vmem %s794_s24, 16  ;;  %s1237_s29 = scalar_lea.vmem %s794_s24, 32 }
  0x7c   : > { %v1554_v10 = vld [vmem:[%s1497_s8 + $0x48] sm:$0xff]  ;;  %v1559_v11 = vld [vmem:[%s1497_s8 + $0x50] sm:$0xff]  ;;  %v1562_v12 = vld [vmem:[%s1497_s8 + $0x58] sm:$0xff]  ;;  %p1232_p2 = scmp.ne.s32.totalorder %s794_s24, %s1231_s27  ;;  %p1238_p1 = scmp.lt.s32.totalorder %s794_s24, %s794_s24 }
  0x7d   : > { %v1567_v13 = vld [vmem:[%s1497_s8 + $0x60] sm:$0xff]  ;;  %v1570_v14 = vld [vmem:[%s1497_s8 + $0x68] sm:$0xff]  ;;  %v1575_v15 = vld [vmem:[%s1497_s8 + $0x70] sm:$0xff]  ;;  %p1239_p12 = scmp.lt.s32.totalorder %s1237_s29, %s1231_s27 }
  0x7e   : > { %420 = vmax.xlane.f32.xlu0 %v1527_v3  ;;  %424 = vmax.xlane.f32.xlu1 %v1530_v4  ;;  %1923 = vst [vmem:[#allocation11_spill] sm:$0xff] %v1570_v14  ;;  %1924 = vst [vmem:[#allocation12_spill] sm:$0xff] %v1575_v15  ;;  %v1578_v16 = vld [vmem:[%s1497_s8 + $0x78] sm:$0xff]  ;;  %p1233_p3 = pnand %p1232_p2, %p1867_p8 }
  0x7f   : > { %1925 = vst [vmem:[#allocation13_spill] sm:$0xff] %v1578_v16  ;;  %p1240_p5 = por %p1239_p12, %p1238_p1 }
  0x80   : > { %p1234_p4 = pneg %p1233_p3 }
  0x82   : > { %426 = vmax.xlane.f32.xlu0 %v1535_v5  ;;  %428 = vmax.xlane.f32.xlu1 %v1538_v6  ;;  %p1241_p9 = pnand %p1240_p5, %p1234_p4 }
  0x86   : > { %430 = vmax.xlane.f32.xlu0 %v1543_v7  ;;  %432 = vmax.xlane.f32.xlu1 %v1546_v8 }
  0x8a   : > { %434 = vmax.xlane.f32.xlu0 %v1551_v9  ;;  %436 = vmax.xlane.f32.xlu1 %v1554_v10 }
  0x8e   : > { %438 = vmax.xlane.f32.xlu0 %v1559_v11  ;;  %440 = vmax.xlane.f32.xlu1 %v1562_v12 }
  0x92   : > { %442 = vmax.xlane.f32.xlu0 %v1567_v13  ;;  %444 = vmax.xlane.f32.xlu1 %v1570_v14 }
  0x96   : > { %446 = vmax.xlane.f32.xlu0 %v1575_v15  ;;  %448 = vmax.xlane.f32.xlu1 %v1578_v16 }
 0x107   : > { %v1582_v17 = vpop.xlane.xlu0 %418  ;;  %v1584_v18 = vpop.xlane.xlu1 %422 }
 0x108   : > { %v450_v19 = vsub.f32 %v1519_v1, %v1582_v17  ;;  %v452_v20 = vsub.f32 %v1522_v2, %v1584_v18 }
 0x10a   : > { %v466_v21 = vmul.f32 1.442695, %v450_v19  ;;  %v470_v22 = vmul.f32 1.442695, %v452_v20 }
 0x10b   : > { %v1590_v23 = vpop.xlane.xlu0 %420  ;;  %v1592_v24 = vpop.xlane.xlu1 %424 }
 0x10c   : > { %1079 = vpow2.f32 %v466_v21  ;;  %v451_v25 = vsub.f32 %v1527_v3, %v1590_v23  ;;  %v453_v26 = vsub.f32 %v1530_v4, %v1592_v24 }
 0x10d   : > { %1081 = vpow2.f32 %v470_v22 }
 0x10e   : > { %v468_v27 = vmul.f32 1.442695, %v451_v25  ;;  %v472_v28 = vmul.f32 1.442695, %v453_v26 }
 0x10f   : > { %v1598_v29 = vpop.xlane.xlu0 %426  ;;  %v1600_v30 = vpop.xlane.xlu1 %428 }
 0x110   : > { %1083 = vpow2.f32 %v468_v27  ;;  %v454_v31 = vsub.f32 %v1535_v5, %v1598_v29  ;;  %v455_v32 = vsub.f32 %v1538_v6, %v1600_v30 }
 0x111   : > { %1085 = vpow2.f32 %v472_v28 }
 0x112   : > { %v474_v33 = vmul.f32 1.442695, %v454_v31  ;;  %v476_v34 = vmul.f32 1.442695, %v455_v32 }
 0x113   : > { %v1606_v35 = vpop.xlane.xlu0 %430  ;;  %v1608_v36 = vpop.xlane.xlu1 %432 }
 0x114   : > { %1087 = vpow2.f32 %v474_v33  ;;  %v456_v37 = vsub.f32 %v1543_v7, %v1606_v35  ;;  %v457_v38 = vsub.f32 %v1546_v8, %v1608_v36 }
 0x115   : > { %1089 = vpow2.f32 %v476_v34 }
 0x116   : > { %v1080_v39 = vpop.eup %1079  ;;  %v478_v40 = vmul.f32 1.442695, %v456_v37  ;;  %v480_v41 = vmul.f32 1.442695, %v457_v38 }
 0x117   : > { %498 = vadd.xlane.f32.xlu0 %v1080_v39  ;;  %v1614_v42 = vpop.xlane.xlu0 %434  ;;  %v1616_v43 = vpop.xlane.xlu1 %436 }
 0x118   : > { %v1082_v44 = vpop.eup %1081  ;;  %1091 = vpow2.f32 %v478_v40  ;;  %v458_v45 = vsub.f32 %v1551_v9, %v1614_v42  ;;  %v459_v46 = vsub.f32 %v1554_v10, %v1616_v43 }
 0x119   : > { %1093 = vpow2.f32 %v480_v41  ;;  %v1915_v41 = vmov 0.0|0.0  }
 0x11a   : > { %v1084_v47 = vpop.eup %1083  ;;  %v482_v48 = vmul.f32 1.442695, %v458_v45  ;;  %v484_v49 = vmul.f32 1.442695, %v459_v46  ;;  %982 = vmatprep.subr.bf16.mxu0 %v1915_v41  ;;  %v337_v45 = vld [vmem:[%s1503_s30] sm:$0xff]  ;;  %v339_v46 = vld [vmem:[%s1503_s30 + $0x10] sm:$0xff] }
 0x11b   : > { %502 = vadd.xlane.f32.xlu0 %v1082_v44  ;;  %500 = vadd.xlane.f32.xlu1 %v1084_v47  ;;  %v1622_v50 = vpop.xlane.xlu0 %438  ;;  %v1624_v51 = vpop.xlane.xlu1 %440  ;;  %v1326_v44 = vmov 0.0   ;;  %v338_v47 = vld [vmem:[%s1503_s30 + $0x8] sm:$0xff] }
 0x11c   : > { %v1086_v52 = vpop.eup %1085  ;;  %1095 = vpow2.f32 %v482_v48  ;;  %v460_v53 = vsub.f32 %v1559_v11, %v1622_v50  ;;  %v461_v54 = vsub.f32 %v1562_v12, %v1624_v51  ;;  %979 = vmatprep.mubr.msk.f32.mxu0 %vm1325_vm0, %v1326_v44  ;;  %v354_v48 = vmul.f32 0.5, %v337_v45 }
 0x11d   : > { %1097 = vpow2.f32 %v484_v49  ;;  %v356_v49 = vmul.f32 0.5, %v339_v46 }
 0x11e   : > { %v1088_v55 = vpop.eup %1087  ;;  %v486_v56 = vmul.f32 1.442695, %v460_v53  ;;  %v488_v57 = vmul.f32 1.442695, %v461_v54  ;;  %v341_v53 = vld [vmem:[%s1503_s30 + $0x20] sm:$0xff]  ;;  %v355_v54 = vmul.f32 0.5, %v338_v47 }
 0x11f   : > { %504 = vadd.xlane.f32.xlu1 %v1086_v52  ;;  %506 = vadd.xlane.f32.xlu0 %v1088_v55  ;;  %v1630_v58 = vpop.xlane.xlu0 %442  ;;  %v1632_v59 = vpop.xlane.xlu1 %444  ;;  %v340_v52 = vld [vmem:[%s1503_s30 + $0x18] sm:$0xff] }
 0x120   : > { %v1090_v60 = vpop.eup %1089  ;;  %1099 = vpow2.f32 %v486_v56  ;;  %v462_v61 = vsub.f32 %v1567_v13, %v1630_v58  ;;  %v463_v62 = vsub.f32 %v1570_v14, %v1632_v59  ;;  %v357_v55 = vmul.f32 0.5, %v340_v52  ;;  %v342_v56 = vld [vmem:[%s1503_s30 + $0x28] sm:$0xff] }
 0x121   : > { %1101 = vpow2.f32 %v488_v57  ;;  %v358_v57 = vmul.f32 0.5, %v341_v53 }
 0x122   : > { %v1092_v63 = vpop.eup %1091  ;;  %v490_v0 = vmul.f32 1.442695, %v462_v61  ;;  %v492_v19 = vmul.f32 1.442695, %v463_v62  ;;  %v359_v61 = vmul.f32 0.5, %v342_v56  ;;  %v344_v62 = vld [vmem:[%s1503_s30 + $0x38] sm:$0xff] }
 0x123   : > { %508 = vadd.xlane.f32.xlu1 %v1090_v60  ;;  %510 = vadd.xlane.f32.xlu0 %v1092_v63  ;;  %v1638_v20 = vpop.xlane.xlu0 %446  ;;  %v1640_v21 = vpop.xlane.xlu1 %448  ;;  %v343_v60 = vld [vmem:[%s1503_s30 + $0x30] sm:$0xff] }
 0x124   : > { %1926 = vst [vmem:[#allocation14_spill] sm:$0xff] %v1640_v21  ;;  %v1094_v22 = vpop.eup %1093  ;;  %1103 = vpow2.f32 %v490_v0  ;;  %v464_v25 = vsub.f32 %v1575_v15, %v1638_v20  ;;  %v465_v26 = vsub.f32 %v1578_v16, %v1640_v21  ;;  %v360_v63 = vmul.f32 0.5, %v343_v60  ;;  %v345_v0 = vld [vmem:[%s1503_s30 + $0x40] sm:$0xff] }
 0x125   : > { %1105 = vpow2.f32 %v492_v19  ;;  %v361_v19 = vmul.f32 0.5, %v344_v62 }
 0x126   : > { %v1096_v27 = vpop.eup %1095  ;;  %v494_v28 = vmul.f32 1.442695, %v464_v25  ;;  %v496_v31 = vmul.f32 1.442695, %v465_v26  ;;  %v613_v25 = vlaneseq  ;;  %v362_v26 = vmul.f32 0.5, %v345_v0 }
 0x127   : > { %512 = vadd.xlane.f32.xlu1 %v1094_v22  ;;  %514 = vadd.xlane.f32.xlu0 %v1096_v27  ;;  %v1098_v32 = vpop.eup %1097  ;;  %v346_v22 = vld [vmem:[%s1503_s30 + $0x48] sm:$0xff] }
 0x128   : > { %1107 = vpow2.f32 %v494_v28 }
 0x129   : > { %1109 = vpow2.f32 %v496_v31 }
 0x12a   : > { %v1100_v33 = vpop.eup %1099  ;;  %1111 = vtanh.f32 %v354_v48 }
 0x12b   : > { %516 = vadd.xlane.f32.xlu1 %v1098_v32  ;;  %518 = vadd.xlane.f32.xlu0 %v1100_v33  ;;  %v1102_v34 = vpop.eup %1101  ;;  %1113 = vtanh.f32 %v356_v49  ;;  %v363_v32 = vmul.f32 0.5, %v346_v22  ;;  %v347_v33 = vld [vmem:[%s1503_s30 + $0x50] sm:$0xff]  ;;  %v349_v49 = vld [vmem:[%s1503_s30 + $0x60] sm:$0xff] }
 0x12c   : > { %1115 = vtanh.f32 %v355_v54  ;;  %v364_v44 = vmul.f32 0.5, %v347_v33  ;;  %v1664_v54 = vstv %s907_s23  ;;  %v366_v62 = vmul.f32 0.5, %v349_v49 }
 0x12d   : > { %1117 = vtanh.f32 %v357_v55  ;;  %v350_v55 = vld [vmem:[%s1503_s30 + $0x68] sm:$0xff] }
 0x12e   : > { %v1104_v37 = vpop.eup %1103  ;;  %1119 = vtanh.f32 %v358_v57 }
 0x12f   : > { %520 = vadd.xlane.f32.xlu1 %v1102_v34  ;;  %522 = vadd.xlane.f32.xlu0 %v1104_v37  ;;  %v1106_v38 = vpop.eup %1105  ;;  %1121 = vtanh.f32 %v359_v61  ;;  %v348_v34 = vld [vmem:[%s1503_s30 + $0x58] sm:$0xff]  ;;  %v1659_v37 = vshrl.u32 %v613_v25, 7 }
 0x130   : > { %1123 = vtanh.f32 %v360_v63  ;;  %v365_v48 = vmul.f32 0.5, %v348_v34 }
 0x131   : > { %1125 = vtanh.f32 %v361_v19  ;;  %v615_v53 = vadd.s32 8, %v1659_v37  ;;  %v616_v33 = vadd.s32 16, %v1659_v37 }
 0x132   : > { %v1108_v39 = vpop.eup %1107 }
 0x133   : > { %524 = vadd.xlane.f32.xlu1 %v1106_v38  ;;  %526 = vadd.xlane.f32.xlu0 %v1108_v39  ;;  %v1110_v40 = vpop.eup %1109 }
 0x134   : > { %v1112_v27 = vpop.eup %1111 }
 0x135   : > { %v1114_v28 = vpop.eup %1113  ;;  %v386_v45 = vmul.f32 0.5, %v1112_v27  ;;  %v367_v27 = vmul.f32 0.5, %v350_v55 }
 0x136   : > { %v1116_v38 = vpop.eup %1115 }
 0x137   : > { %528 = vadd.xlane.f32.xlu1 %v1110_v40  ;;  %v1118_v39 = vpop.eup %1117  ;;  %v388_v40 = vmul.f32 0.5, %v1114_v28  ;;  %v387_v60 = vmul.f32 0.5, %v1116_v38  ;;  %v1669_v63 = vadd.f32 0.5, %v386_v45  ;;  %v351_v28 = vld [vmem:[%s1503_s30 + $0x70] sm:$0xff] }
 0x138   : > { %v1120_v52 = vpop.eup %1119  ;;  %v389_v57 = vmul.f32 0.5, %v1118_v39 }
 0x139   : > { %v1122_v56 = vpop.eup %1121  ;;  %v1667_v61 = vadd.f32 0.5, %v388_v40  ;;  %v390_v22 = vmul.f32 0.5, %v1120_v52  ;;  %v1682_v39 = vadd.f32 0.5, %v387_v60  ;;  %v617_v40 = vadd.s32 24, %v1659_v37 }
 0x13a   : > { %v1124_v0 = vpop.eup %1123  ;;  %v1680_v38 = vadd.f32 0.5, %v389_v57  ;;  %v1694_v60 = vadd.s32 %v1664_v54, %v616_v33 }
 0x13b   : > { %v1126_v34 = vpop.eup %1125  ;;  %v392_v45 = vmul.f32 0.5, %v1124_v0  ;;  %v1686_v52 = vadd.f32 0.5, %v390_v22 }
 0x13c   : > { %v393_v22 = vmul.f32 0.5, %v1126_v34  ;;  %v620_v34 = vadd.s32 48, %v1659_v37  ;;  %vm649_vm3 = vcmp.lt.s32.totalorder %v1694_v60, 240  ;;  %v624_v60 = vadd.s32 80, %v1659_v37 }
 0x1a4   : > { %v499_v31 = vpop.xlane.xlu0 %498 }
 0x1a5   : > { %1127 = vlog2.f32 %v499_v31  ;;  %v391_v31 = vmul.f32 0.5, %v1122_v56  ;;  %v619_v56 = vadd.s32 40, %v1659_v37 }
 0x1a6   : > { %1129 = vtanh.f32 %v362_v26  ;;  %v1673_v26 = vadd.s32 %v1664_v54, %v1659_v37 }
 0x1a7   : > { %1131 = vtanh.f32 %v363_v32  ;;  %v1677_v32 = vadd.s32 %v1664_v54, %v615_v53  ;;  %v1690_v57 = vadd.f32 0.5, %v391_v31 }
 0x1a8   : > { %v501_v46 = vpop.xlane.xlu1 %500  ;;  %v503_v47 = vpop.xlane.xlu0 %502  ;;  %vm647_vm1 = vcmp.lt.s32.totalorder %v1673_v26, 240  ;;  %v623_v26 = vadd.s32 72, %v1659_v37 }
 0x1a9   : > { %1133 = vlog2.f32 %v501_v46  ;;  %v368_v46 = vmul.f32 0.5, %v351_v28  ;;  %vm648_vm2 = vcmp.lt.s32.totalorder %v1677_v32, 240  ;;  %v1701_v28 = vadd.f32 0.5, %v392_v45 }
 0x1aa   : > { %1135 = vlog2.f32 %v503_v47  ;;  %v618_v47 = vadd.s32 32, %v1659_v37  ;;  %vm1739_vm7 = vmpackc.low %vm648_vm2, %vm647_vm1 }
 0x1ab   : > { %1137 = vtanh.f32 %v364_v44 }
 0x1ac   : > { %v505_v19 = vpop.xlane.xlu1 %504  ;;  %v507_v25 = vpop.xlane.xlu0 %506  ;;  %1139 = vtanh.f32 %v365_v48 }
 0x1ad   : > { %1141 = vlog2.f32 %v505_v19 }
 0x1ae   : > { %1143 = vlog2.f32 %v507_v25  ;;  %v1699_v25 = vadd.s32 %v1664_v54, %v617_v40 }
 0x1af   : > { %v1128_v44 = vpop.eup %1127  ;;  %1145 = vtanh.f32 %v366_v62  ;;  %v352_v62 = vld [vmem:[%s1503_s30 + $0x78] sm:$0xff] }
 0x1b0   : > { %v1130_v48 = vpop.eup %1129  ;;  %v531_v49 = vmul.f32 0.6931472, %v1128_v44  ;;  %v509_v53 = vpop.xlane.xlu1 %508  ;;  %1147 = vtanh.f32 %v367_v27  ;;  %v1704_v44 = vadd.s32 %v1664_v54, %v618_v47  ;;  %v369_v21 = vmul.f32 0.5, %v352_v62 }
 0x1b1   : > { %v511_v55 = vpop.xlane.xlu0 %510  ;;  %1149 = vlog2.f32 %v509_v53  ;;  %v1132_v0 = vpop.eup %1131  ;;  %v394_v31 = vmul.f32 0.5, %v1130_v48  ;;  %v1713_v48 = vadd.f32 0.5, %v393_v22  ;;  %vm650_vm4 = vcmp.lt.s32.totalorder %v1699_v25, 240 }
 0x1b2   : > { %v562_v19 = vadd.f32 %v531_v49, %v1582_v17  ;;  %1151 = vlog2.f32 %v511_v55  ;;  %v1707_v17 = vadd.s32 %v1664_v54, %v619_v56  ;;  %vm651_vm5 = vcmp.lt.s32.totalorder %v1704_v44, 240  ;;  %vm1766_vm9 = vmpackc.low %vm650_vm4, %vm649_vm3 }
 0x1b3   : > { %v1134_v27 = vpop.eup %1133  ;;  %1153 = vtanh.f32 %v368_v46  ;;  %v1717_v62 = vadd.f32 0.5, %v394_v31  ;;  %v641_v44 = vadd.s32 %v1664_v54, %v624_v60 }
 0x1b4   : > { %v1136_v53 = vpop.eup %1135  ;;  %v533_v33 = vmul.f32 0.6931472, %v1134_v27  ;;  %v513_v41 = vpop.xlane.xlu1 %512  ;;  %v578_v49 = vsub.f32 %v562_v19, %v1519_v1  ;;  %v395_v27 = vmul.f32 0.5, %v1132_v0  ;;  %v621_v1 = vadd.s32 56, %v1659_v37 }
 0x1b5   : > { %v515_v16 = vpop.xlane.xlu0 %514  ;;  %v1138_v40 = vpop.eup %1137  ;;  %v535_v45 = vmul.f32 0.6931472, %v1136_v53  ;;  %1155 = vlog2.f32 %v513_v41  ;;  %vm652_vm6 = vcmp.lt.s32.totalorder %v1707_v17, 240  ;;  %vm657_vm15 = vcmp.lt.s32.totalorder %v641_v44, 240  ;;  %v353_v44 = vld [vmem:[%s313_s20] sm:$0x1] }
 0x1b6   : > { %v1140_v46 = vpop.eup %1139  ;;  %v563_v47 = vadd.f32 %v533_v33, %v1590_v23  ;;  %1157 = vlog2.f32 %v515_v16  ;;  %v1724_v16 = vadd.s32 %v1664_v54, %v620_v34  ;;  %v396_v0 = vmul.f32 0.5, %v1138_v40  ;;  %vm1791_vm11 = vmpackc.low %vm652_vm6, %vm651_vm5 }
 0x1b7   : > { %v1142_v55 = vpop.eup %1141  ;;  %v564_v56 = vadd.f32 %v535_v45, %v1584_v18  ;;  %1159 = vtanh.f32 %v369_v21  ;;  %v594_v22 = vmul.f32 %v578_v49, %v1669_v63  ;;  %v1733_v34 = vadd.f32 0.5, %v395_v27 }
 0x1b8   : > { %v1144_v19 = vpop.eup %1143  ;;  %v579_v41 = vsub.f32 %v563_v47, %v1527_v3  ;;  %v537_v53 = vmul.f32 0.6931472, %v1142_v55  ;;  %v517_v15 = vpop.xlane.xlu1 %516  ;;  %vm653_vm8 = vcmp.lt.s32.totalorder %v1724_v16, 240  ;;  %v1753_v27 = vadd.f32 0.5, %v396_v0 }
 0x1b9   : > { %v519_v14 = vpop.xlane.xlu0 %518  ;;  %v1146_v18 = vpop.eup %1145  ;;  %v539_v23 = vmul.f32 0.6931472, %v1144_v19  ;;  %1161 = vlog2.f32 %v517_v15  ;;  %v580_v3 = vsub.f32 %v564_v56, %v1522_v2  ;;  %v1744_v2 = vadd.s32 %v1664_v54, %v621_v1 }
 0x1ba   : > { %v1727_v31 = vpop.eup %1147  ;;  %v565_v33 = vadd.f32 %v537_v53, %v1592_v24  ;;  %1163 = vlog2.f32 %v519_v14  ;;  %v595_v21 = vmul.f32 %v579_v41, %v1682_v39  ;;  %v622_v14 = vadd.s32 64, %v1659_v37 }
 0x1bb   : > { %v1150_v45 = vpop.eup %1149  ;;  %v566_v47 = vadd.f32 %v539_v23, %v1598_v29  ;;  %v596_v1 = vmul.f32 %v580_v3, %v1667_v61  ;;  %v397_v23 = vmul.f32 0.5, %v1140_v46  ;;  %vm654_vm10 = vcmp.lt.s32.totalorder %v1744_v2, 240 }
 0x1bc   : > { %v1152_v24 = vpop.eup %1151  ;;  %v581_v63 = vsub.f32 %v565_v33, %v1530_v4  ;;  %v541_v39 = vmul.f32 0.6931472, %v1150_v45  ;;  %v521_v29 = vpop.xlane.xlu1 %520  ;;  %v983_v49 = vpack.c.bf16 %v595_v21, %v594_v22  ;;  %v1929_v22 = vmov 0.0|0.0   ;;  %vm1812_vm13 = vmpackc.low %vm654_vm10, %vm653_vm8 }
 0x1bd   : > { %v523_v40 = vpop.xlane.xlu0 %522  ;;  %v1750_v32 = vpop.eup %1153  ;;  %v582_v55 = vsub.f32 %v566_v47, %v1535_v5  ;;  %v543_v56 = vmul.f32 0.6931472, %v1152_v24  ;;  %1165 = vlog2.f32 %v521_v29  ;;  %v625_v21 = vadd.s32 88, %v1659_v37 }
 0x1be   : > { %v597_v4 = vmul.f32 %v581_v63, %v1680_v38  ;;  %v567_v19 = vadd.f32 %v541_v39, %v1600_v30  ;;  %1167 = vlog2.f32 %v523_v40  ;;  %985 = vmatpush3.bf16.msk.msra.mxu0 %vm1739_vm7, %v983_v49  ;;  %v1772_v30 = vadd.s32 %v1664_v54, %v622_v14 }
 0x1bf   : > { %v1156_v41 = vpop.eup %1155  ;;  %v568_v53 = vadd.f32 %v543_v56, %v1606_v35  ;;  %986 = vmatprep.subr.bf16.mxu0 %v1929_v22  ;;  %v598_v25 = vmul.f32 %v582_v55, %v1686_v52  ;;  %v413_v52 = vadd.f32 0.5, %v397_v23  ;;  %v398_v63 = vmul.f32 0.5, %v1146_v18 }
 0x1c0   : > { %v1158_v61 = vpop.eup %1157  ;;  %v583_v38 = vsub.f32 %v567_v19, %v1538_v6  ;;  %v545_v35 = vmul.f32 0.6931472, %v1156_v41  ;;  %v525_v46 = vpop.xlane.xlu1 %524  ;;  %v987_v3 = vpack.c.bf16 %v597_v4, %v596_v1  ;;  %vm655_vm12 = vcmp.lt.s32.totalorder %v1772_v30, 240 }
 0x1c1   : > { %v527_v0 = vpop.xlane.xlu0 %526  ;;  %v547_v33 = vmul.f32 0.6931472, %v1158_v61  ;;  %1169 = vlog2.f32 %v525_v46  ;;  %v1778_v45 = vpop.eup %1159  ;;  %v584_v15 = vsub.f32 %v568_v53, %v1543_v7  ;;  %v640_v7 = vadd.s32 %v1664_v54, %v623_v26 }
 0x1c2   : > { %v599_v47 = vmul.f32 %v583_v38, %v1690_v57  ;;  %v569_v6 = vadd.f32 %v545_v35, %v1608_v36  ;;  %1171 = vlog2.f32 %v527_v0  ;;  %989 = vmatpush3.bf16.msk.msra.mxu0 %vm1766_vm9, %v987_v3  ;;  %v642_v17 = vadd.s32 %v1664_v54, %v625_v21 }
 0x1c3   : > { %v1162_v14 = vpop.eup %1161  ;;  %v570_v24 = vadd.f32 %v547_v33, %v1614_v42  ;;  %990 = vmatprep.subr.bf16.mxu0 %v1929_v22  ;;  %v600_v49 = vmul.f32 %v584_v15, %v1701_v28  ;;  %vm656_vm14 = vcmp.lt.s32.totalorder %v640_v7, 240  ;;  %v399_v16 = vmul.f32 0.5, %v1727_v31  ;;  %v1940_v7 = vld [vmem:[#allocation14_spill] sm:$0xff] }
 0x1c4   : > { %v1164_v36 = vpop.eup %1163  ;;  %v585_v39 = vsub.f32 %v569_v6, %v1546_v8  ;;  %v549_v29 = vmul.f32 0.6931472, %v1162_v14  ;;  %v529_v40 = vpop.xlane.xlu1 %528  ;;  %v991_v42 = vpack.c.bf16 %v599_v47, %v598_v25  ;;  %vm658_vm0 = vcmp.lt.s32.totalorder %v642_v17, 240  ;;  %vm1831_vm1 = vmpackc.low %vm656_vm14, %vm655_vm12  ;;  %v711_v17 = vld [vmem:[#allocation7] sm:$0x1] }
 0x1c5   : > { %v551_v18 = vmul.f32 0.6931472, %v1164_v36  ;;  %1173 = vlog2.f32 %v529_v40  ;;  %v586_v26 = vsub.f32 %v570_v24, %v1551_v9  ;;  %v626_v9 = vadd.s32 96, %v1659_v37  ;;  %vm1004_vm2 = vmpackc.low %vm658_vm0, %vm657_vm15 }
 0x1c6   : > { %v601_v55 = vmul.f32 %v585_v39, %v1713_v48  ;;  %v571_v56 = vadd.f32 %v549_v29, %v1616_v43  ;;  %993 = vmatpush3.bf16.msk.msra.mxu0 %vm1791_vm11, %v991_v42  ;;  %v627_v43 = vadd.s32 104, %v1659_v37  ;;  %v629_v0 = vadd.s32 120, %v1659_v37  ;;  %v1941_v39 = vld [vmem:[#allocation13_spill] sm:$0xff] }
 0x1c7   : > { %v1166_v8 = vpop.eup %1165  ;;  %v572_v1 = vadd.f32 %v551_v18, %v1622_v50  ;;  %994 = vmatprep.subr.bf16.mxu0 %v1929_v22  ;;  %v414_v50 = vadd.f32 0.5, %v398_v63  ;;  %v602_v2 = vmul.f32 %v586_v26, %v1717_v62  ;;  %v643_v62 = vadd.s32 %v1664_v54, %v626_v9 }
 0x1c8   : > { %v1168_v48 = vpop.eup %1167  ;;  %v587_v4 = vsub.f32 %v571_v56, %v1554_v10  ;;  %v553_v19 = vmul.f32 0.6931472, %v1166_v8  ;;  %v995_v41 = vpack.c.bf16 %v601_v55, %v600_v49  ;;  %v415_v3 = vadd.f32 0.5, %v399_v16 }
 0x1c9   : > { %v555_v53 = vmul.f32 0.6931472, %v1168_v48  ;;  %v588_v5 = vsub.f32 %v572_v1, %v1559_v11  ;;  %v644_v11 = vadd.s32 %v1664_v54, %v627_v43  ;;  %v400_v30 = vmul.f32 0.5, %v1750_v32  ;;  %v1938_v32 = vld [vmem:[#allocation11_spill] sm:$0xff] }
 0x1ca   : > { %v603_v23 = vmul.f32 %v587_v4, %v1733_v34  ;;  %v573_v61 = vadd.f32 %v553_v19, %v1624_v51  ;;  %997 = vmatpush3.bf16.msk.msra.mxu0 %vm1812_vm13, %v995_v41  ;;  %v628_v51 = vadd.s32 112, %v1659_v37  ;;  %v401_v25 = vmul.f32 0.5, %v1778_v45 }
 0x1cb   : > { %v1170_v10 = vpop.eup %1169  ;;  %v574_v38 = vadd.f32 %v555_v53, %v1630_v58  ;;  %998 = vmatprep.subr.bf16.mxu0 %v1929_v22  ;;  %v604_v33 = vmul.f32 %v588_v5, %v1753_v27  ;;  %vm659_vm3 = vcmp.lt.s32.totalorder %v643_v62, 240  ;;  %vm660_vm4 = vcmp.lt.s32.totalorder %v644_v11, 240 }
 0x1cc   : > { %v1172_v34 = vpop.eup %1171  ;;  %v589_v35 = vsub.f32 %v573_v61, %v1562_v12  ;;  %v557_v46 = vmul.f32 0.6931472, %v1170_v10  ;;  %v999_v58 = vpack.c.bf16 %v603_v23, %v602_v2  ;;  %v645_v37 = vadd.s32 %v1664_v54, %v628_v51  ;;  %vm1008_vm5 = vmpackc.low %vm660_vm4, %vm659_vm3 }
 0x1cd   : > { %v559_v60 = vmul.f32 0.6931472, %v1172_v34  ;;  %v590_v47 = vsub.f32 %v574_v38, %v1567_v13  ;;  %v416_v14 = vadd.f32 0.5, %v400_v30  ;;  %v417_v24 = vadd.f32 0.5, %v401_v25 }
 0x1ce   : > { %v605_v21 = vmul.f32 %v589_v35, %v413_v52  ;;  %v575_v15 = vadd.f32 %v557_v46, %v1632_v59  ;;  %1001 = vmatpush3.bf16.msk.msra.mxu0 %vm1831_vm1, %v999_v58  ;;  %v646_v59 = vadd.s32 %v1664_v54, %v629_v0  ;;  %vm661_vm6 = vcmp.lt.s32.totalorder %v645_v37, 240 }
 0x1cf   : > { %v1174_v12 = vpop.eup %1173  ;;  %v576_v6 = vadd.f32 %v559_v60, %v1638_v20  ;;  %1002 = vmatprep.subr.bf16.mxu0 %v1929_v22  ;;  %v606_v52 = vmul.f32 %v590_v47, %v414_v50  ;;  %v1939_v20 = vld [vmem:[#allocation12_spill] sm:$0xff] }
 0x1d0   : > { %v591_v27 = vsub.f32 %v575_v15, %v1938_v32  ;;  %v561_v13 = vmul.f32 0.6931472, %v1174_v12  ;;  %v1003_v45 = vpack.c.bf16 %v605_v21, %v604_v33  ;;  %vm662_vm7 = vcmp.lt.s32.totalorder %v646_v59, 240 }
 0x1d1   : > { %v592_v57 = vsub.f32 %v576_v6, %v1939_v20  ;;  %vm1012_vm8 = vmpackc.low %vm662_vm7, %vm661_vm6 }
 0x1d2   : > { %v607_v63 = vmul.f32 %v591_v27, %v415_v3  ;;  %v577_v36 = vadd.f32 %v561_v13, %v1940_v7  ;;  %1005 = vmatpush3.bf16.msk.msra.mxu0 %vm1004_vm2, %v1003_v45 }
 0x1d3   : > { %1006 = vmatprep.subr.bf16.mxu0 %v1929_v22  ;;  %v608_v54 = vmul.f32 %v592_v57, %v416_v14 }
 0x1d4   : > { %v593_v29 = vsub.f32 %v577_v36, %v1941_v39  ;;  %v1007_v40 = vpack.c.bf16 %v607_v63, %v606_v52 }
 0x1d6   : > { %v609_v42 = vmul.f32 %v593_v29, %v417_v24  ;;  %1009 = vmatpush3.bf16.msk.msra.mxu0 %vm1008_vm5, %v1007_v40 }
 0x1d7   : > { %1010 = vmatprep.subr.bf16.mxu0 %v1929_v22 }
 0x1d8   : > { %v1011_v18 = vpack.c.bf16 %v609_v42, %v608_v54 }
 0x1da   : > { %1013 = vmatpush3.bf16.msk.msra.mxu0 %vm1012_vm8, %v1011_v18 }
 0x1dd   : > { %980 = vmatmul.mubr.f32.vlgmr.msra.gmra.mrb[0].mxu0 %v353_v44 }
 0x2b0   : > { %v778_v49 = vpop.f32.mrb[0].mxu0 }
 0x2b1   : > { %v782_v22 = vadd.f32 %v778_v49, %v711_v17  ;;  %v981_v55 = vpop.f32.mrb[1].mxu0 }
 0x2b3   : > { %783 = vst [vmem:[#allocation7] sm:$0x1] %v782_v22 }
 0x2b4   : > { %1244 = shalt.err (!%p1241_p9)
}
 0x2b5   : > { %s1245_s22 = scalar_lea.hbm %s1914_s3, 16 }
 0x2b6   : > { %p1246_p10 = scmp.ne.s32.totalorder %s1914_s3, %s1245_s22  ;;  %p1251_p13 = scmp.lt.u32.totalorder %s1245_s22, %s1914_s3 }
 0x2b8   : > { %p1247_p6 = pnand %p1246_p10, %p1867_p8 }
 0x2ba   : > { %p1248_p11 = pneg %p1247_p6 }
 0x2bc   : > { %p1253_p7 = pnand %p1251_p13, %p1248_p11 }
 0x2be   : > { %1256 = shalt.err (!%p1253_p7)
}
 0x2bf   : > { %1017 = dma.vmem_to_hbm [thread:$0]  (%p1867_p8), %s794_s24, 16, %s1914_s3, [#allocation4]  }
 0x2c0   : > { %1290 = dma.done.wait (%p1867_p8), [#allocation4], 16  }
 0x2c1   : > { %1292 = vsyncadd (%p1867_p8), [#allocation4], 4294967280 }
 0x2c2 PF: > { %s20_s17 = sadd.s32 1, %s1315_s17   ;;  %s1943_s12 = smov %s1299_s13 }
 0x2c3   : > { %p17_p0 = scmp.ge.s32.totalorder %s20_s17, 4   ;;  %s1944_s13 = smov %s1303_s14 }
 0x2c4   : > { %s1945_s14 = smov %s1403_s26  ;;  %s1946_s15 = smov %s1311_s16 }
 0x2c5   : > { %s1947_s16 = smov %s1949_s18  ;;  %19 = sbr.rel (!%p17_p0) target bundleno = 7 (0x7), region = 90 }
 0x2cc   :  { %806 = vsyncpa [#allocation3], 1 }
 0x2cd   :  { %808 = vsyncpa [#allocation3 + $0x1], 1 }
 0x2ce   :  { %809 = vsyncpa [#allocation6], 1 }
 0x2cf   :  { %811 = vsyncpa [#allocation6 + $0x1], 1 }
 0x2d0   :  { %812 = vsyncpa [#allocation4], 1 }
 0x2d1   :  { %814 = vsyncpa [#allocation4 + $0x1], 1 }

</bundles_post_ra>
